<compile_context>
chip_gen: v6e
topology: v6e:2x2x1
jax: 0.10.0
libtpu: 0.0.40
codegen_flags: <defaults>
</compile_context>

<pallas_src>
import jax
import jax.numpy as jnp
from jax.experimental import pallas as pl
from jax.experimental.pallas import tpu as pltpu

# Small synthetic config (consistent with the module's shape conventions)
HIDDEN_SIZE = 32            # model_config.hidden_size
PROJ_SIZE = 16              # config.context_vision_projection_size (projection_flag=True)
IMAGE_SIZE = 16
PATCH_SIZE = 4
PATCH_NUM = IMAGE_SIZE // PATCH_SIZE
SEQ_LEN = PATCH_NUM * PATCH_NUM + 1   # +1 CLS token -> 17
BATCH = 2


def _round_up(x, m):
    return ((x + m - 1) // m) * m


def _projection_kernel(x_ref, w_ref, b_ref, o_ref):
    # x_ref: (TM, H)   w_ref: (H, Ppad)   b_ref: (1, Ppad) f32   o_ref: (TM, Ppad)
    y = jnp.dot(x_ref[...], w_ref[...],
                preferred_element_type=jnp.float32)        # MXU, f32 accumulate
    o_ref[...] = (y + b_ref[...]).astype(o_ref.dtype)      # f32 epilogue, cast at store


def vision_encoder_forward(features, w_proj, b_proj, *, stream_dtype=None):
    """features: (B, S, H) backbone last_hidden_state.
    w_proj: (H, P) = torch Linear weight transposed.  b_proj: (P,).
    stream_dtype: optional narrower dtype (e.g. jnp.bfloat16) for x/w/out HBM
    streams; accumulation stays f32 regardless."""
    B, S, H = features.shape
    P = w_proj.shape[1]
    M = B * S

    dtype = jnp.dtype(stream_dtype) if stream_dtype is not None else jnp.dtype(features.dtype)
    itemsize = dtype.itemsize
    sub = {4: 8, 2: 16, 1: 32}.get(itemsize, 8)            # min sublane tile per dtype

    # Collapse batch+sequence into one M row axis; cast streams once here.
    x2d = features.reshape(M, H).astype(dtype)
    w = w_proj.astype(dtype)

    # M tile: big streamed tiles at real sizes, but keep >=2 tiles when M allows
    # so the "parallel" grid axis shards across v7x's 2 TensorCores.
    if M >= 1024:
        TM = 512
    elif M > 256:
        TM = 256
    else:
        TM = _round_up(M, sub)                              # single (possibly ragged) tile
    grid_m = pl.cdiv(M, TM)                                 # ragged last tile handled by Pallas

    # Lane-dense output: pad projection dim only when misaligned (zero columns /
    # zero bias in the pad); real CLIP sizes (512/768/1024) take the no-pad path.
    P_pad = _round_up(P, 128)
    if P_pad != P:
        w = jnp.pad(w, ((0, 0), (0, P_pad - P)))
        b = jnp.pad(b_proj, (0, P_pad - P))
    else:
        b = b_proj
    b = b.astype(jnp.float32).reshape(1, P_pad)             # f32 epilogue bias

    # VMEM budget: x/out double-buffered, weights/bias single- (or double-) buffered.
    def _vmem_needed(n_wbuf):
        return (2 * TM * H * itemsize
                + 2 * TM * P_pad * itemsize
                + n_wbuf * H * P_pad * itemsize
                + n_wbuf * 8 * P_pad * 4                    # bias, sublane-padded
                + (1 << 20))                                # internal scratch margin
    vmem_limit = int(min(max(2 * _vmem_needed(2), 16 << 20), 48 << 20))

    cost = pl.CostEstimate(
        flops=2 * M * H * P_pad,
        transcendentals=0,
        bytes_accessed=(M * H * itemsize                    # x stream
                        + H * P_pad * itemsize              # weights (fetched once)
                        + P_pad * 4                         # bias (f32)
                        + M * P_pad * itemsize),            # out stream
    )

    def _run(single_buffer_weights):
        if single_buffer_weights:
            # Constant index_map -> the second pipeline buffer is dead weight.
            w_spec = pl.BlockSpec((H, P_pad), lambda m: (0, 0),
                                  pipeline_mode=pl.Buffered(1))
            b_spec = pl.BlockSpec((1, P_pad), lambda m: (0, 0),
                                  pipeline_mode=pl.Buffered(1))
        else:
            w_spec = pl.BlockSpec((H, P_pad), lambda m: (0, 0))
            b_spec = pl.BlockSpec((1, P_pad), lambda m: (0, 0))
        out = pl.pallas_call(
            _projection_kernel,
            out_shape=jax.ShapeDtypeStruct((M, P_pad), dtype),   # rows = M, no row pad
            grid=(grid_m,),
            in_specs=[
                pl.BlockSpec((TM, H), lambda m: (m, 0)),     # x tiles stream over M
                w_spec,                                      # weights resident
                b_spec,                                      # bias resident (f32)
            ],
            out_specs=pl.BlockSpec((TM, P_pad), lambda m: (m, 0)),  # lane-dense stores
            compiler_params=pltpu.CompilerParams(
                dimension_semantics=("parallel",),           # shard M across TCs on v7x
                vmem_limit_bytes=vmem_limit),
            cost_estimate=cost,
        )(x2d, w, b)
        return jax.block_until_ready(out)

    try:
        out2d = _run(single_buffer_weights=True)
    except Exception:
        # TODO(synk): this JAX build rejected pipeline_mode=pl.Buffered(1);
        # fall back to default double-buffered resident weights/bias.
        out2d = _run(single_buffer_weights=False)

    hidden = out2d if P_pad == P else out2d[:, :P]
    hidden_states = hidden.reshape(B, S, P)                  # contiguous reshape: no copy

    # att_mask = torch.ones((B, patch_num**2 + 1)) — trivial, plain JAX glue;
    # pinned to float32 to match torch.ones' default regardless of feature dtype.
    att_mask = jnp.ones((B, S), dtype=jnp.float32)
    return {"hidden_states": hidden_states, "attention_mask": att_mask}


if __name__ == "__main__":
    key = jax.random.PRNGKey(0)
    k_feat, k_w, k_b = jax.random.split(key, 3)

    # Synthetic backbone output (stand-in for self.model(**inputs).last_hidden_state)
    features = jax.random.normal(k_feat, (BATCH, SEQ_LEN, HIDDEN_SIZE), jnp.float32)

    # Deterministic projection params. PyTorch nn.Linear stores weight as (P, H);
    # we build the transposed (H, P) layout the kernel consumes directly.
    w_proj = jax.random.normal(k_w, (HIDDEN_SIZE, PROJ_SIZE), jnp.float32) / jnp.sqrt(
        jnp.float32(HIDDEN_SIZE))
    b_proj = jax.random.normal(k_b, (PROJ_SIZE,), jnp.float32) * 0.01

    out = vision_encoder_forward(features, w_proj, b_proj)
    jax.block_until_ready(out["hidden_states"])
    jax.block_until_ready(out["attention_mask"])

    # Correctness check against a plain-JAX reference of the same math.
    ref = features @ w_proj + b_proj
    assert out["hidden_states"].shape == (BATCH, SEQ_LEN, PROJ_SIZE)
    assert out["attention_mask"].shape == (BATCH, SEQ_LEN)
    assert out["hidden_states"].dtype == features.dtype
    assert jnp.allclose(out["hidden_states"], ref, atol=1e-5), "f32 projection mismatch"
    assert jnp.all(out["attention_mask"] == 1.0)

    # bf16 streaming path (per perf review): halves HBM traffic at real ViT/CLIP
    # sizes; f32 accumulation keeps the error small.
    out_bf16 = vision_encoder_forward(features, w_proj, b_proj, stream_dtype=jnp.bfloat16)
    jax.block_until_ready(out_bf16["hidden_states"])
    max_err = jnp.max(jnp.abs(out_bf16["hidden_states"].astype(jnp.float32) - ref))
    assert out_bf16["hidden_states"].shape == (BATCH, SEQ_LEN, PROJ_SIZE)
    assert max_err < 1e-1, f"bf16 projection mismatch (max err {max_err})"

    print("KERNEL_OK")
</pallas_src>

<mosaic_0001>
module attributes {stable_mosaic.version = 11 : i64} {
  func.func @_projection_kernel(%arg0: i32, %arg1: memref<40x32xf32, #tpu.memory_space<vmem>>, %arg2: memref<32x128xf32, #tpu.memory_space<vmem>>, %arg3: memref<1x128xf32, #tpu.memory_space<vmem>>, %arg4: memref<40x128xf32, #tpu.memory_space<vmem>>) attributes {dimension_semantics = [#tpu.dimension_semantics<parallel>], iteration_bounds = array<i64: 1>, scalar_prefetch = 0 : i64, scratch_operands = 0 : i64, tpu.core_type = #tpu.core_type<tc>, window_params = [{transform_indices = @transform_0, window_bounds = array<i64: 40, 32>}, {pipeline_mode = #tpu.pipeline_mode<synchronous>, transform_indices = @transform_1, window_bounds = array<i64: 32, 128>}, {pipeline_mode = #tpu.pipeline_mode<synchronous>, transform_indices = @transform_2, window_bounds = array<i64: 1, 128>}, {transform_indices = @transform_3, window_bounds = array<i64: 40, 128>}]} {
    %c0 = arith.constant 0 : index
    %c0_0 = arith.constant 0 : index
    %0 = vector.load %arg1[%c0, %c0_0] : memref<40x32xf32, #tpu.memory_space<vmem>>, vector<40x32xf32>
    %c0_1 = arith.constant 0 : index
    %c0_2 = arith.constant 0 : index
    %1 = vector.load %arg2[%c0_1, %c0_2] : memref<32x128xf32, #tpu.memory_space<vmem>>, vector<32x128xf32>
    %cst = arith.constant dense<0.000000e+00> : vector<40x128xf32>
    %2 = tpu.matmul %0, %1, %cst {dimension_numbers = #tpu.dot_dimension_numbers<[1], [0], [0], [1], [0, 0, 1, 1], [], []>} : vector<40x32xf32>, vector<32x128xf32>, vector<40x128xf32> -> vector<40x128xf32>
    %c0_3 = arith.constant 0 : index
    %c0_4 = arith.constant 0 : index
    %3 = vector.load %arg3[%c0_3, %c0_4] : memref<1x128xf32, #tpu.memory_space<vmem>>, vector<1x128xf32>
    %4 = vector.broadcast %3 : vector<1x128xf32> to vector<40x128xf32>
    %5 = arith.addf %2, %4 : vector<40x128xf32>
    %c0_5 = arith.constant 0 : index
    %c0_6 = arith.constant 0 : index
    %6 = vector.load %arg4[%c0_5, %c0_6] : memref<40x128xf32, #tpu.memory_space<vmem>>, vector<40x128xf32>
    tpu.vector_store %arg4[%c0_5, %c0_6], %5 {strides = array<i32>} : memref<40x128xf32, #tpu.memory_space<vmem>>, vector<40x128xf32>,
    return
  }
  func.func @transform_0(%arg0: i32) -> (i32, i32) {
    %c0_i32 = arith.constant 0 : i32
    %c0_i32_0 = arith.constant 0 : i32
    return %arg0, %c0_i32 : i32, i32
  }
  func.func @transform_1(%arg0: i32) -> (i32, i32) {
    %c0_i32 = arith.constant 0 : i32
    %c0_i32_0 = arith.constant 0 : i32
    %c0_i32_1 = arith.constant 0 : i32
    return %c0_i32, %c0_i32_0 : i32, i32
  }
  func.func @transform_2(%arg0: i32) -> (i32, i32) {
    %c0_i32 = arith.constant 0 : i32
    %c0_i32_0 = arith.constant 0 : i32
    %c0_i32_1 = arith.constant 0 : i32
    return %c0_i32, %c0_i32_0 : i32, i32
  }
  func.func @transform_3(%arg0: i32) -> (i32, i32) {
    %c0_i32 = arith.constant 0 : i32
    %c0_i32_0 = arith.constant 0 : i32
    return %arg0, %c0_i32 : i32, i32
  }
}

module attributes {stable_mosaic.version = 11 : i64} {
  func.func @_projection_kernel(%arg0: i32, %arg1: memref<40x32xf32, #tpu.memory_space<vmem>>, %arg2: memref<32x128xf32, #tpu.memory_space<vmem>>, %arg3: memref<1x128xf32, #tpu.memory_space<vmem>>, %arg4: memref<40x128xf32, #tpu.memory_space<vmem>>) attributes {dimension_semantics = [#tpu.dimension_semantics<parallel>], iteration_bounds = array<i64: 1>, scalar_prefetch = 0 : i64, scratch_operands = 0 : i64, tpu.core_type = #tpu.core_type<tc>, window_params = [{transform_indices = @transform_0, window_bounds = array<i64: 40, 32>}, {pipeline_mode = #tpu.pipeline_mode<synchronous>, transform_indices = @transform_1, window_bounds = array<i64: 32, 128>}, {pipeline_mode = #tpu.pipeline_mode<synchronous>, transform_indices = @transform_2, window_bounds = array<i64: 1, 128>}, {transform_indices = @transform_3, window_bounds = array<i64: 40, 128>}]} {
    %c0 = arith.constant 0 : index
    %c0_0 = arith.constant 0 : index
    %0 = vector.load %arg1[%c0, %c0_0] : memref<40x32xf32, #tpu.memory_space<vmem>>, vector<40x32xf32>
    %c0_1 = arith.constant 0 : index
    %c0_2 = arith.constant 0 : index
    %1 = vector.load %arg2[%c0_1, %c0_2] : memref<32x128xf32, #tpu.memory_space<vmem>>, vector<32x128xf32>
    %cst = arith.constant dense<0.000000e+00> : vector<40x128xf32>
    %2 = tpu.matmul %0, %1, %cst {dimension_numbers = #tpu.dot_dimension_numbers<[1], [0], [0], [1], [0, 0, 1, 1], [], []>} : vector<40x32xf32>, vector<32x128xf32>, vector<40x128xf32> -> vector<40x128xf32>
    %c0_3 = arith.constant 0 : index
    %c0_4 = arith.constant 0 : index
    %3 = vector.load %arg3[%c0_3, %c0_4] : memref<1x128xf32, #tpu.memory_space<vmem>>, vector<1x128xf32>
    %4 = vector.broadcast %3 : vector<1x128xf32> to vector<40x128xf32>
    %5 = arith.addf %2, %4 : vector<40x128xf32>
    %c0_5 = arith.constant 0 : index
    %c0_6 = arith.constant 0 : index
    %6 = vector.load %arg4[%c0_5, %c0_6] : memref<40x128xf32, #tpu.memory_space<vmem>>, vector<40x128xf32>
    tpu.vector_store %arg4[%c0_5, %c0_6], %5 {strides = array<i32>} : memref<40x128xf32, #tpu.memory_space<vmem>>, vector<40x128xf32>,
    return
  }
  func.func @transform_0(%arg0: i32) -> (i32, i32) {
    %c0_i32 = arith.constant 0 : i32
    %c0_i32_0 = arith.constant 0 : i32
    return %arg0, %c0_i32 : i32, i32
  }
  func.func @transform_1(%arg0: i32) -> (i32, i32) {
    %c0_i32 = arith.constant 0 : i32
    %c0_i32_0 = arith.constant 0 : i32
    %c0_i32_1 = arith.constant 0 : i32
    return %c0_i32, %c0_i32_0 : i32, i32
  }
  func.func @transform_2(%arg0: i32) -> (i32, i32) {
    %c0_i32 = arith.constant 0 : i32
    %c0_i32_0 = arith.constant 0 : i32
    %c0_i32_1 = arith.constant 0 : i32
    return %c0_i32, %c0_i32_0 : i32, i32
  }
  func.func @transform_3(%arg0: i32) -> (i32, i32) {
    %c0_i32 = arith.constant 0 : i32
    %c0_i32_0 = arith.constant 0 : i32
    return %arg0, %c0_i32 : i32, i32
  }
}

</mosaic_0001>

<bundles_post_ra>
// kernel: tpu_custom_call.1
= control target key start
LH: loop header
LB: loop body
LE: loop exit
PB: predicated region body
PF: predicated region fallthrough
CT: control target
= control target key end

     0   :  { %v231_v1 = vmov 0.0   ;;  %s294_s0 = inlined_call_operand.vmem [shape: f32[34,32], index: 0, kind: input, shape index: {}]   ;;  %s295_s1 = inlined_call_operand.vmem [shape: f32[32,128], index: 1, kind: input, shape index: {}]   ;;  %s296_s2 = inlined_call_operand.vmem [shape: f32[1,128], index: 2, kind: input, shape index: {}]   ;;  %s297_s3 = inlined_call_operand.hbm [shape: f32[34,128], index: 3, kind: output, shape index: {}]  }
   0x1   :  { %v23_v0 = vld [vmem:[%s295_s1 + $0x18] sm:$0xff]  ;;  %173 = vmatprep.subr.mxu0 %v231_v1  ;;  %196 = vmatprep.subr.mxu1 %v231_v1  ;;  %v22_v2 = vld [vmem:[%s295_s1 + $0x10] sm:$0xff]  ;;  %v21_v3 = vld [vmem:[%s295_s1 + $0x8] sm:$0xff] }
   0x2   :  { %174 = vmatpush3.msra.mxu0 %v23_v0  ;;  %200 = vmatpush3.msra.mxu1 %v23_v0 }
   0x3   :  { %175 = vmatprep.subr.mxu0 %v231_v1  ;;  %197 = vmatprep.subr.mxu1 %v231_v1 }
   0x4   :  { %8 = vsyncpa [#allocation3], 0  ;;  %176 = vmatpush3.msra.mxu0 %v22_v2  ;;  %201 = vmatpush3.msra.mxu1 %v22_v2  ;;  %v20_v4 = vld [vmem:[%s295_s1] sm:$0xff]  ;;  %vm31_vm0 = vcmask 261120   ;;  %vm232_vm1 = vmmov 0   ;;  %v18_v6 = vld [vmem:[%s294_s0 + $0x18] sm:$0xff] }
   0x5   :  { %177 = vmatprep.subr.mxu0 %v231_v1  ;;  %198 = vmatprep.subr.mxu1 %v231_v1  ;;  %v15_v5 = vld [vmem:[%s294_s0] sm:$0xff]  ;;  %v16_v7 = vld [vmem:[%s294_s0 + $0x8] sm:$0xff]  ;;  %v17_v9 = vld [vmem:[%s294_s0 + $0x10] sm:$0xff]  ;;  %s233_s4 = smov [#allocation2]  }
   0x6   :  { %178 = vmatpush3.msra.mxu0 %v21_v3  ;;  %202 = vmatpush3.msra.mxu1 %v21_v3  ;;  %v19_v8 = vld [vmem:[%s294_s0 + $0x20] sm:$0xff]  ;;  %s147_s0 = sshll.u32 %s233_s4, 4  ;;  %s148_s0 = int_to_ptr.vmem [resolvable:$true] %s147_s0 }
   0x7   :  { %179 = vmatprep.subr.mxu0 %v231_v1  ;;  %181 = vmatprep.mubr.msk.f32.mxu0 %vm232_vm1, %v231_v1  ;;  %v158_v10 = vld [vmem:[%s296_s2] ss:$0 sm:$0xff]  ;;  %s209_s2 = scalar_lea.vmem %s148_s0, 640  ;;  %p214_p1 = scmp.lt.s32.totalorder %s148_s0, %s148_s0 }
   0x8   :  { %180 = vmatpush3.msra.mxu0 %v20_v4  ;;  %199 = vmatprep.subr.mxu1 %v231_v1  ;;  %p210_p0 = scmp.ne.s32.totalorder %s148_s0, %s209_s2  ;;  %p215_p2 = scmp.lt.s32.totalorder %s209_s2, %s209_s2 }
   0x9   :  { %182 = vmatmul.mubr.msk.f32.vlgmr.msra.gmra.mxu0 %vm31_vm0, %v15_v5  ;;  %203 = vmatpush3.msra.mxu1 %v20_v4 }
   0xa   :  { %190 = vmatprep.mubr.msk.f32.mxu1 %vm232_vm1, %v231_v1  ;;  %184 = vmatprep.mubr.msk.f32.mxu0 %vm232_vm1, %v231_v1  ;;  %p216_p3 = por %p215_p2, %p214_p1 }
   0xb   :  { %191 = vmatmul.mubr.msk.f32.vlgmr.msra.gmra.mxu1 %vm31_vm0, %v18_v6 }
   0xc   :  { %193 = vmatprep.mubr.msk.f32.mxu1 %vm232_vm1, %v231_v1  ;;  %p217_p4 = pnand %p216_p3, %p210_p0 }
   0xd   :  { %185 = vmatmul.mubr.msk.f32.gmra.mxu0 %vm31_vm0, %v16_v7 }
   0xe   :  { %187 = vmatprep.mubr.msk.f32.mxu0 %vm232_vm1, %v231_v1 }
   0xf   :  { %194 = vmatmul.mubr.msk.f32.gmra.mxu1 %vm31_vm0, %v19_v8 }
  0x11   :  { %188 = vmatmul.mubr.msk.f32.gmra.mxu0 %vm31_vm0, %v17_v9 }
  0xc9   :  { %v113_v11 = vpop.f32.mrf.mxu0 }
  0xca   :  { %v114_v12 = vadd.f32 %v158_v10, %v113_v11 }
  0xcb   :  { %v183_v13 = vpop.f32.mrf.mxu0  ;;  %v128_v14 = vpop.f32.mrf.mxu1 }
  0xcc   :  { %137 = vst [vmem:[#allocation2] sm:$0xff] %v114_v12  ;;  %v129_v15 = vadd.f32 %v158_v10, %v128_v14 }
  0xcd   :  { %v118_v16 = vpop.f32.mrf.mxu0  ;;  %v192_v17 = vpop.f32.mrf.mxu1 }
  0xce   :  { %140 = vst [vmem:[#allocation2 + $0x18] sm:$0xff] %v129_v15  ;;  %v119_v18 = vadd.f32 %v158_v10, %v118_v16 }
  0xcf   :  { %v186_v19 = vpop.f32.mrf.mxu0  ;;  %v133_v20 = vpop.f32.mrf.mxu1 }
  0xd0   :  { %138 = vst [vmem:[#allocation2 + $0x8] sm:$0xff] %v119_v18  ;;  %v134_v21 = vadd.f32 %v158_v10, %v133_v20 }
  0xd1   :  { %v123_v22 = vpop.f32.mrf.mxu0  ;;  %v195_v23 = vpop.f32.mrf.mxu1 }
  0xd2   :  { %141 = vst [vmem:[#allocation2 + $0x20] sm:$0xff] %v134_v21  ;;  %v124_v24 = vadd.f32 %v158_v10, %v123_v22 }
  0xd3   :  { %v189_v25 = vpop.f32.mrf.mxu0 }
  0xd4   :  { %139 = vst [vmem:[#allocation2 + $0x10] sm:$0xff] %v124_v24 }
  0xd5   :  { %220 = shalt.err (!%p217_p4)
}
  0xd6   :  { %s234_s5 = smov 128   ;;  %s235_s6 = smov 8  }
  0xd7   :  { %153 = dma.vmem_to_hbm [thread:$0]  %s148_s0, 640, %s297_s3, [#allocation3], %s234_s5, %s234_s5, %s235_s6  }
  0xd8   :  { %229 = dma.done.wait [#allocation3], 640  }
  0xd9   :  { %230 = vsyncadd [#allocation3], 4294966656 }
  0xda   :  { %157 = vsyncpa [#allocation3], 1 }

// kernel: tpu_custom_call.1
= control target key start
LH: loop header
LB: loop body
LE: loop exit
PB: predicated region body
PF: predicated region fallthrough
CT: control target
= control target key end

     0   :  { %v231_v1 = vmov 0.0   ;;  %s294_s0 = inlined_call_operand.vmem [shape: f32[34,32], index: 0, kind: input, shape index: {}]   ;;  %s295_s1 = inlined_call_operand.vmem [shape: f32[32,128], index: 1, kind: input, shape index: {}]   ;;  %s296_s2 = inlined_call_operand.vmem [shape: f32[1,128], index: 2, kind: input, shape index: {}]   ;;  %s297_s3 = inlined_call_operand.hbm [shape: f32[34,128], index: 3, kind: output, shape index: {}]  }
   0x1   :  { %v23_v0 = vld [vmem:[%s295_s1 + $0x18] sm:$0xff]  ;;  %173 = vmatprep.subr.mxu0 %v231_v1  ;;  %196 = vmatprep.subr.mxu1 %v231_v1  ;;  %v22_v2 = vld [vmem:[%s295_s1 + $0x10] sm:$0xff]  ;;  %v21_v3 = vld [vmem:[%s295_s1 + $0x8] sm:$0xff] }
   0x2   :  { %174 = vmatpush3.msra.mxu0 %v23_v0  ;;  %200 = vmatpush3.msra.mxu1 %v23_v0 }
   0x3   :  { %175 = vmatprep.subr.mxu0 %v231_v1  ;;  %197 = vmatprep.subr.mxu1 %v231_v1 }
   0x4   :  { %8 = vsyncpa [#allocation3], 0  ;;  %176 = vmatpush3.msra.mxu0 %v22_v2  ;;  %201 = vmatpush3.msra.mxu1 %v22_v2  ;;  %v20_v4 = vld [vmem:[%s295_s1] sm:$0xff]  ;;  %vm31_vm0 = vcmask 261120   ;;  %vm232_vm1 = vmmov 0   ;;  %v18_v6 = vld [vmem:[%s294_s0 + $0x18] sm:$0xff] }
   0x5   :  { %177 = vmatprep.subr.mxu0 %v231_v1  ;;  %198 = vmatprep.subr.mxu1 %v231_v1  ;;  %v15_v5 = vld [vmem:[%s294_s0] sm:$0xff]  ;;  %v16_v7 = vld [vmem:[%s294_s0 + $0x8] sm:$0xff]  ;;  %v17_v9 = vld [vmem:[%s294_s0 + $0x10] sm:$0xff]  ;;  %s233_s4 = smov [#allocation2]  }
   0x6   :  { %178 = vmatpush3.msra.mxu0 %v21_v3  ;;  %202 = vmatpush3.msra.mxu1 %v21_v3  ;;  %v19_v8 = vld [vmem:[%s294_s0 + $0x20] sm:$0xff]  ;;  %s147_s0 = sshll.u32 %s233_s4, 4  ;;  %s148_s0 = int_to_ptr.vmem [resolvable:$true] %s147_s0 }
   0x7   :  { %179 = vmatprep.subr.mxu0 %v231_v1  ;;  %181 = vmatprep.mubr.msk.f32.mxu0 %vm232_vm1, %v231_v1  ;;  %v158_v10 = vld [vmem:[%s296_s2] ss:$0 sm:$0xff]  ;;  %s209_s2 = scalar_lea.vmem %s148_s0, 640  ;;  %p214_p1 = scmp.lt.s32.totalorder %s148_s0, %s148_s0 }
   0x8   :  { %180 = vmatpush3.msra.mxu0 %v20_v4  ;;  %199 = vmatprep.subr.mxu1 %v231_v1  ;;  %p210_p0 = scmp.ne.s32.totalorder %s148_s0, %s209_s2  ;;  %p215_p2 = scmp.lt.s32.totalorder %s209_s2, %s209_s2 }
   0x9   :  { %182 = vmatmul.mubr.msk.f32.vlgmr.msra.gmra.mxu0 %vm31_vm0, %v15_v5  ;;  %203 = vmatpush3.msra.mxu1 %v20_v4 }
   0xa   :  { %190 = vmatprep.mubr.msk.f32.mxu1 %vm232_vm1, %v231_v1  ;;  %184 = vmatprep.mubr.msk.f32.mxu0 %vm232_vm1, %v231_v1  ;;  %p216_p3 = por %p215_p2, %p214_p1 }
   0xb   :  { %191 = vmatmul.mubr.msk.f32.vlgmr.msra.gmra.mxu1 %vm31_vm0, %v18_v6 }
   0xc   :  { %193 = vmatprep.mubr.msk.f32.mxu1 %vm232_vm1, %v231_v1  ;;  %p217_p4 = pnand %p216_p3, %p210_p0 }
   0xd   :  { %185 = vmatmul.mubr.msk.f32.gmra.mxu0 %vm31_vm0, %v16_v7 }
   0xe   :  { %187 = vmatprep.mubr.msk.f32.mxu0 %vm232_vm1, %v231_v1 }
   0xf   :  { %194 = vmatmul.mubr.msk.f32.gmra.mxu1 %vm31_vm0, %v19_v8 }
  0x11   :  { %188 = vmatmul.mubr.msk.f32.gmra.mxu0 %vm31_vm0, %v17_v9 }
  0xc9   :  { %v113_v11 = vpop.f32.mrf.mxu0 }
  0xca   :  { %v114_v12 = vadd.f32 %v158_v10, %v113_v11 }
  0xcb   :  { %v183_v13 = vpop.f32.mrf.mxu0  ;;  %v128_v14 = vpop.f32.mrf.mxu1 }
  0xcc   :  { %137 = vst [vmem:[#allocation2] sm:$0xff] %v114_v12  ;;  %v129_v15 = vadd.f32 %v158_v10, %v128_v14 }
  0xcd   :  { %v118_v16 = vpop.f32.mrf.mxu0  ;;  %v192_v17 = vpop.f32.mrf.mxu1 }
  0xce   :  { %140 = vst [vmem:[#allocation2 + $0x18] sm:$0xff] %v129_v15  ;;  %v119_v18 = vadd.f32 %v158_v10, %v118_v16 }
  0xcf   :  { %v186_v19 = vpop.f32.mrf.mxu0  ;;  %v133_v20 = vpop.f32.mrf.mxu1 }
  0xd0   :  { %138 = vst [vmem:[#allocation2 + $0x8] sm:$0xff] %v119_v18  ;;  %v134_v21 = vadd.f32 %v158_v10, %v133_v20 }
  0xd1   :  { %v123_v22 = vpop.f32.mrf.mxu0  ;;  %v195_v23 = vpop.f32.mrf.mxu1 }
  0xd2   :  { %141 = vst [vmem:[#allocation2 + $0x20] sm:$0xff] %v134_v21  ;;  %v124_v24 = vadd.f32 %v158_v10, %v123_v22 }
  0xd3   :  { %v189_v25 = vpop.f32.mrf.mxu0 }
  0xd4   :  { %139 = vst [vmem:[#allocation2 + $0x10] sm:$0xff] %v124_v24 }
  0xd5   :  { %220 = shalt.err (!%p217_p4)
}
  0xd6   :  { %s234_s5 = smov 128   ;;  %s235_s6 = smov 8  }
  0xd7   :  { %153 = dma.vmem_to_hbm [thread:$0]  %s148_s0, 640, %s297_s3, [#allocation3], %s234_s5, %s234_s5, %s235_s6  }
  0xd8   :  { %229 = dma.done.wait [#allocation3], 640  }
  0xd9   :  { %230 = vsyncadd [#allocation3], 4294966656 }
  0xda   :  { %157 = vsyncpa [#allocation3], 1 }

</bundles_post_ra>
